<compile_context>
chip_gen: v6e
topology: v6e:2x2x1
jax: 0.10.0
libtpu: 0.0.40
codegen_flags: <defaults>
</compile_context>

<pallas_src>
import math

import jax
import jax.numpy as jnp
from jax.experimental import pallas as pl
from jax.experimental.pallas import tpu as pltpu

# ---- model hyper-parameters (from model_params) -----------------------------
EMBEDDING_DIM = 32
HEAD_NUM = 4
QKV_DIM = 8
SQRT_EMBEDDING_DIM = math.sqrt(float(EMBEDDING_DIM))
LOGIT_CLIPPING = 10.0

# ---- problem sizes -----------------------------------------------------------
BATCH = 2
POMO = 8          # number of query rows ("n" in the PyTorch code)
PROBLEM = 16      # number of nodes ("input_s")

DX = EMBEDDING_DIM + 4          # input_cat feature dim (36)
DX_PAD = 64                     # padded, lane-friendly contraction dim
HP = HEAD_NUM * PROBLEM         # heads folded into lanes within a batch

_P_IS_POW2 = (PROBLEM & (PROBLEM - 1)) == 0
_P_SHIFT = PROBLEM.bit_length() - 1


def _chunk_index(idx):
    """idx // PROBLEM, as a bit-shift when PROBLEM is a power of two (VPU-cheap)."""
    if _P_IS_POW2:
        return idx >> _P_SHIFT
    return idx // PROBLEM


def _fast_recip(d):
    """EUP approximate reciprocal + two Newton steps (keeps 1e-5 f32 match)."""
    r = pl.reciprocal(d, approx=True)
    r = r * (2.0 - d * r)
    r = r * (2.0 - d * r)
    return r


# =============================================================================
# Pallas kernel: one grid step == one batch element (all heads, all POMO rows)
# =============================================================================
def decoder_kernel(x_ref, wq_ref, kt_ref, mask_attn_ref, vc_ref, bias_ref,
                   shk_ref, mask_fin_ref, out_ref):
    """Per-batch ref shapes (H=heads, D=qkv_dim, E=embedding, P=problem, n=pomo):

      x_ref         : (1, n, DX_PAD)   input_cat, feature dim zero-padded to 64
      wq_ref        : (DX_PAD, H*D)    Wq_last, rows zero-padded (shared)
      kt_ref        : (1, H*D, H*P)    per-batch K^T, block-diag over heads,
                                       1/sqrt(qkv_dim) folded in
      mask_attn_ref : (1, n, H*P)      ninf mask broadcast over heads
      vc_ref        : (1, H*P, E)      V with multi_head_combine folded in
      bias_ref      : (1, E)           combine bias (shared)
      shk_ref       : (1, E, P)        single_head_key / sqrt(embedding_dim)
      mask_fin_ref  : (1, n, P)        ninf mask for the final softmax
      out_ref       : (1, n, P)        probabilities
    """
    # q_last = Wq_last(input_cat)                              -> (n, H*D)
    q = jnp.dot(x_ref[0], wq_ref[...], preferred_element_type=jnp.float32)

    # multi-head scores, attention scale folded into kt        -> (n, H*P)
    s = jnp.dot(q, kt_ref[0], preferred_element_type=jnp.float32)
    s = s + mask_attn_ref[0]

    # Per-head chunked softmax along the lane axis.  Subtracting the global
    # row max is exact (constant shift within each chunk); the per-chunk sums
    # come from one MXU matmul against an in-kernel block-diagonal segment
    # matrix (built from iota, no HBM DMA for constants).  The epsilon guard
    # turns fully-masked / underflowed chunks into 0 instead of NaN.
    m = jnp.max(s, axis=-1, keepdims=True)
    e = jnp.exp(s - m)                                          # exp(-inf) -> 0
    rc = _chunk_index(jax.lax.broadcasted_iota(jnp.int32, (HP, HP), 0))
    cc = _chunk_index(jax.lax.broadcasted_iota(jnp.int32, (HP, HP), 1))
    seg = jnp.where(rc == cc, 1.0, 0.0).astype(jnp.float32)
    denom = jnp.dot(e, seg, preferred_element_type=jnp.float32) + 1e-30
    w = e * _fast_recip(denom)

    # attention output with multi_head_combine folded into V   -> (n, E)
    mh = jnp.dot(w, vc_ref[0], preferred_element_type=jnp.float32)
    mh = mh + bias_ref[...]

    # single-head score, 1/sqrt(embedding_dim) folded into shk -> (n, P)
    sc = jnp.dot(mh, shk_ref[0], preferred_element_type=jnp.float32)
    sc = LOGIT_CLIPPING * jnp.tanh(sc) + mask_fin_ref[0]

    m2 = jnp.max(sc, axis=-1, keepdims=True)
    e2 = jnp.exp(sc - m2)
    d2 = jnp.sum(e2, axis=-1, keepdims=True)
    out_ref[0] = e2 * _fast_recip(d2)


# =============================================================================
# set_kv-style one-time state setup (plain-JAX glue): fold scales / combine
# weights and build per-batch operands (O(B) footprint, no batch block-diag).
# =============================================================================
def build_decoder_state(k, v, single_head_key, wq_last, w_combine, b_combine):
    B = k.shape[0]
    scale = 1.0 / math.sqrt(float(QKV_DIM))

    # per-batch K^T, block-diagonal over heads, attention scale folded in:
    # kt[b] : (H*D, H*P)
    kt = jnp.stack([
        jax.scipy.linalg.block_diag(
            *[k[b, h].T * scale for h in range(HEAD_NUM)])
        for b in range(B)])

    # multi_head_combine folded into V:  vc[b] : (H*P, E)
    wc3 = w_combine.reshape(HEAD_NUM, QKV_DIM, EMBEDDING_DIM)
    vc = jnp.einsum('bhsd,hde->bhse', v, wc3).reshape(
        B, HEAD_NUM * PROBLEM, EMBEDDING_DIM)

    # single_head_key pre-scaled by 1/sqrt(embedding_dim): shk[b] : (E, P)
    shk = single_head_key / SQRT_EMBEDDING_DIM

    # Wq_last with its input-feature axis zero-padded to DX_PAD (lane aligned)
    wq_pad = jnp.zeros((DX_PAD, HEAD_NUM * QKV_DIM), jnp.float32)
    wq_pad = wq_pad.at[:DX, :].set(wq_last)

    return dict(wq=wq_pad, kt=kt, vc=vc, shk=shk, bias=b_combine)


# =============================================================================
# forward() wrapper: layout plumbing + one pallas_call with grid over batch
# =============================================================================
@jax.jit
def cvrp_decoder_forward(state, encoded_last_node, pre_step_color, ninf_mask):
    B, n, _ = encoded_last_node.shape
    P = ninf_mask.shape[-1]
    hp = HEAD_NUM * P
    hd = HEAD_NUM * QKV_DIM

    input_cat = jnp.concatenate([encoded_last_node, pre_step_color], axis=2)
    # zero-pad the contraction dim of the first matmul (36 -> 64)
    x = jnp.pad(input_cat, ((0, 0), (0, 0), (0, DX_PAD - input_cat.shape[-1])))

    # ninf mask broadcast over heads, lanes ordered (head, node)
    mask_attn = jnp.broadcast_to(
        ninf_mask[:, :, None, :], (B, n, HEAD_NUM, P)).reshape(B, n, hp)

    out = pl.pallas_call(
        decoder_kernel,
        out_shape=jax.ShapeDtypeStruct((B, n, P), jnp.float32),
        grid=(B,),
        in_specs=[
            pl.BlockSpec((1, n, DX_PAD), lambda b: (b, 0, 0)),        # x
            pl.BlockSpec((DX_PAD, hd), lambda b: (0, 0)),             # wq (shared)
            pl.BlockSpec((1, hd, hp), lambda b: (b, 0, 0)),           # kt
            pl.BlockSpec((1, n, hp), lambda b: (b, 0, 0)),            # mask_attn
            pl.BlockSpec((1, hp, EMBEDDING_DIM), lambda b: (b, 0, 0)),# vc
            pl.BlockSpec((1, EMBEDDING_DIM), lambda b: (0, 0)),       # bias (shared)
            pl.BlockSpec((1, EMBEDDING_DIM, P), lambda b: (b, 0, 0)), # shk
            pl.BlockSpec((1, n, P), lambda b: (b, 0, 0)),             # mask_fin
        ],
        out_specs=pl.BlockSpec((1, n, P), lambda b: (b, 0, 0)),
        compiler_params=pltpu.CompilerParams(
            dimension_semantics=("parallel",)),
    )(x, state['wq'], state['kt'], mask_attn, state['vc'], state['bias'],
      state['shk'], ninf_mask)

    return out                      # (B, n, P), natural layout — no transpose


# ---- pure-JAX reference (mirrors the PyTorch forward) -----------------------
def reference_forward(input_cat, k, v, single_head_key, ninf_mask,
                      wq_last, w_combine, b_combine):
    B, n, _ = input_cat.shape
    q_flat = input_cat @ wq_last                                  # (B, n, H*D)
    q = q_flat.reshape(B, n, HEAD_NUM, QKV_DIM).transpose(0, 2, 1, 3)
    score = jnp.einsum('bhnd,bhsd->bhns', q, k) / math.sqrt(float(QKV_DIM))
    score = score + ninf_mask[:, None, :, :]
    weights = jax.nn.softmax(score, axis=-1)
    out = jnp.einsum('bhns,bhsd->bhnd', weights, v)
    out_concat = out.transpose(0, 2, 1, 3).reshape(B, n, HEAD_NUM * QKV_DIM)
    mh = out_concat @ w_combine + b_combine[0]
    sc = jnp.einsum('bne,bes->bns', mh, single_head_key) / SQRT_EMBEDDING_DIM
    sc = LOGIT_CLIPPING * jnp.tanh(sc) + ninf_mask
    return jax.nn.softmax(sc, axis=-1)


if __name__ == "__main__":
    key = jax.random.PRNGKey(0)
    ks = jax.random.split(key, 10)

    # ---- deterministic parameter init (shapes per module __init__) ----------
    hd = HEAD_NUM * QKV_DIM
    wq_last = 0.1 * jax.random.normal(ks[0], (EMBEDDING_DIM + 4, hd), jnp.float32)
    wk = 0.1 * jax.random.normal(ks[1], (EMBEDDING_DIM, hd), jnp.float32)
    wv = 0.1 * jax.random.normal(ks[2], (EMBEDDING_DIM, hd), jnp.float32)
    w_combine = 0.1 * jax.random.normal(ks[3], (hd, EMBEDDING_DIM), jnp.float32)
    b_combine = 0.1 * jax.random.normal(ks[4], (1, EMBEDDING_DIM), jnp.float32)

    # ---- inputs --------------------------------------------------------------
    encoded_nodes = jax.random.normal(ks[5], (BATCH, PROBLEM, EMBEDDING_DIM),
                                      jnp.float32)
    encoded_last_node = jax.random.normal(ks[6], (BATCH, POMO, EMBEDDING_DIM),
                                          jnp.float32)
    pre_step_color = jax.random.normal(ks[7], (BATCH, POMO, 4), jnp.float32)
    mask_bits = jax.random.bernoulli(ks[8], 0.3, (BATCH, POMO, PROBLEM))
    ninf_mask = jnp.where(mask_bits, -jnp.inf, 0.0).astype(jnp.float32)
    # guarantee at least one unmasked entry per row
    ninf_mask = ninf_mask.at[:, :, 0].set(0.0)

    # ---- set_kv (plain JAX glue, module state setup) -------------------------
    k = (encoded_nodes @ wk).reshape(BATCH, PROBLEM, HEAD_NUM,
                                     QKV_DIM).transpose(0, 2, 1, 3)
    v = (encoded_nodes @ wv).reshape(BATCH, PROBLEM, HEAD_NUM,
                                     QKV_DIM).transpose(0, 2, 1, 3)
    single_head_key = encoded_nodes.transpose(0, 2, 1)   # (B, E, PROBLEM)

    state = build_decoder_state(k, v, single_head_key,
                                wq_last, w_combine, b_combine)

    # ---- forward --------------------------------------------------------------
    probs = cvrp_decoder_forward(state, encoded_last_node, pre_step_color,
                                 ninf_mask)
    probs = jax.block_until_ready(probs)

    input_cat = jnp.concatenate([encoded_last_node, pre_step_color], axis=2)
    ref = reference_forward(input_cat, k, v, single_head_key, ninf_mask,
                            wq_last, w_combine, b_combine)

    assert probs.shape == (BATCH, POMO, PROBLEM)
    assert jnp.allclose(probs, ref, atol=1e-5, rtol=1e-5), \
        f"max abs err {jnp.max(jnp.abs(probs - ref))}"

    print("KERNEL_OK")
</pallas_src>

<mosaic_0001>
module attributes {stable_mosaic.version = 11 : i64} {
  func.func @decoder_kernel(%arg0: i32, %arg1: memref<1x8x64xf32, #tpu.memory_space<vmem>>, %arg2: memref<64x32xf32, #tpu.memory_space<vmem>>, %arg3: memref<1x32x64xf32, #tpu.memory_space<vmem>>, %arg4: memref<1x8x64xf32, #tpu.memory_space<vmem>>, %arg5: memref<1x64x32xf32, #tpu.memory_space<vmem>>, %arg6: memref<1x32xf32, #tpu.memory_space<vmem>>, %arg7: memref<1x32x16xf32, #tpu.memory_space<vmem>>, %arg8: memref<1x8x16xf32, #tpu.memory_space<vmem>>, %arg9: memref<1x8x16xf32, #tpu.memory_space<vmem>>) attributes {dimension_semantics = [#tpu.dimension_semantics<parallel>], iteration_bounds = array<i64: 2>, scalar_prefetch = 0 : i64, scratch_operands = 0 : i64, tpu.core_type = #tpu.core_type<tc>, window_params = [{transform_indices = @transform_0, window_bounds = array<i64: 1, 8, 64>}, {pipeline_mode = #tpu.pipeline_mode<synchronous>, transform_indices = @transform_1, window_bounds = array<i64: 64, 32>}, {transform_indices = @transform_2, window_bounds = array<i64: 1, 32, 64>}, {transform_indices = @transform_3, window_bounds = array<i64: 1, 8, 64>}, {transform_indices = @transform_4, window_bounds = array<i64: 1, 64, 32>}, {pipeline_mode = #tpu.pipeline_mode<synchronous>, transform_indices = @transform_5, window_bounds = array<i64: 1, 32>}, {transform_indices = @transform_6, window_bounds = array<i64: 1, 32, 16>}, {transform_indices = @transform_7, window_bounds = array<i64: 1, 8, 16>}, {transform_indices = @transform_8, window_bounds = array<i64: 1, 8, 16>}]} {
    %c0 = arith.constant 0 : index
    %c0_0 = arith.constant 0 : index
    %c0_1 = arith.constant 0 : index
    %0 = vector.load %arg1[%c0, %c0_0, %c0_1] : memref<1x8x64xf32, #tpu.memory_space<vmem>>, vector<1x8x64xf32>
    %1 = vector.shape_cast %0 : vector<1x8x64xf32> to vector<8x64xf32>
    %c0_2 = arith.constant 0 : index
    %c0_3 = arith.constant 0 : index
    %2 = vector.load %arg2[%c0_2, %c0_3] : memref<64x32xf32, #tpu.memory_space<vmem>>, vector<64x32xf32>
    %cst = arith.constant dense<0.000000e+00> : vector<8x32xf32>
    %3 = tpu.matmul %1, %2, %cst {dimension_numbers = #tpu.dot_dimension_numbers<[1], [0], [0], [1], [0, 0, 1, 1], [], []>} : vector<8x64xf32>, vector<64x32xf32>, vector<8x32xf32> -> vector<8x32xf32>
    %c0_4 = arith.constant 0 : index
    %c0_5 = arith.constant 0 : index
    %c0_6 = arith.constant 0 : index
    %4 = vector.load %arg3[%c0_4, %c0_5, %c0_6] : memref<1x32x64xf32, #tpu.memory_space<vmem>>, vector<1x32x64xf32>
    %5 = vector.shape_cast %4 : vector<1x32x64xf32> to vector<32x64xf32>
    %cst_7 = arith.constant dense<0.000000e+00> : vector<8x64xf32>
    %6 = tpu.matmul %3, %5, %cst_7 {dimension_numbers = #tpu.dot_dimension_numbers<[1], [0], [0], [1], [0, 0, 1, 1], [], []>} : vector<8x32xf32>, vector<32x64xf32>, vector<8x64xf32> -> vector<8x64xf32>
    %c0_8 = arith.constant 0 : index
    %c0_9 = arith.constant 0 : index
    %c0_10 = arith.constant 0 : index
    %7 = vector.load %arg4[%c0_8, %c0_9, %c0_10] : memref<1x8x64xf32, #tpu.memory_space<vmem>>, vector<1x8x64xf32>
    %8 = vector.shape_cast %7 : vector<1x8x64xf32> to vector<8x64xf32>
    %9 = arith.addf %6, %8 : vector<8x64xf32>
    %cst_11 = arith.constant dense<0xFF800000> : vector<8xf32>
    %10 = vector.multi_reduction <maximumf>, %9, %cst_11 [1] : vector<8x64xf32> to vector<8xf32>
    %11 = vector.shape_cast %10 : vector<8xf32> to vector<8x1xf32>
    %12 = vector.broadcast %11 : vector<8x1xf32> to vector<8x64xf32>
    %13 = arith.subf %9, %12 : vector<8x64xf32>
    %14 = math.exp %13 : vector<8x64xf32>
    %15 = tpu.iota {dimensions = array<i32: 0>} : vector<64x64xi32>
    %c4_i32 = arith.constant 4 : i32
    %16 = vector.broadcast %c4_i32 : i32 to vector<64x64xi32>
    %17 = arith.shrsi %15, %16 : vector<64x64xi32>
    %18 = tpu.iota {dimensions = array<i32: 1>} : vector<64x64xi32>
    %c4_i32_12 = arith.constant 4 : i32
    %19 = vector.broadcast %c4_i32_12 : i32 to vector<64x64xi32>
    %20 = arith.shrsi %18, %19 : vector<64x64xi32>
    %21 = arith.cmpi eq, %17, %20 : vector<64x64xi32>
    %cst_13 = arith.constant 1.000000e+00 : f32
    %cst_14 = arith.constant 0.000000e+00 : f32
    %22 = vector.broadcast %cst_13 : f32 to vector<64x64xf32>
    %23 = vector.broadcast %cst_14 : f32 to vector<64x64xf32>
    %24 = arith.select %21, %22, %23 : vector<64x64xi1>, vector<64x64xf32>
    %cst_15 = arith.constant dense<0.000000e+00> : vector<8x64xf32>
    %25 = tpu.matmul %14, %24, %cst_15 {dimension_numbers = #tpu.dot_dimension_numbers<[1], [0], [0], [1], [0, 0, 1, 1], [], []>} : vector<8x64xf32>, vector<64x64xf32>, vector<8x64xf32> -> vector<8x64xf32>
    %cst_16 = arith.constant 1.000000e-30 : f32
    %26 = vector.broadcast %cst_16 : f32 to vector<8x64xf32>
    %27 = arith.addf %25, %26 : vector<8x64xf32>
    %28 = tpu.reciprocal %27 {approx = true} : vector<8x64xf32> -> vector<8x64xf32>
    %29 = arith.mulf %27, %28 : vector<8x64xf32>
    %cst_17 = arith.constant 2.000000e+00 : f32
    %30 = vector.broadcast %cst_17 : f32 to vector<8x64xf32>
    %31 = arith.subf %30, %29 : vector<8x64xf32>
    %32 = arith.mulf %28, %31 : vector<8x64xf32>
    %33 = arith.mulf %27, %32 : vector<8x64xf32>
    %cst_18 = arith.constant 2.000000e+00 : f32
    %34 = vector.broadcast %cst_18 : f32 to vector<8x64xf32>
    %35 = arith.subf %34, %33 : vector<8x64xf32>
    %36 = arith.mulf %32, %35 : vector<8x64xf32>
    %37 = arith.mulf %14, %36 : vector<8x64xf32>
    %c0_19 = arith.constant 0 : index
    %c0_20 = arith.constant 0 : index
    %c0_21 = arith.constant 0 : index
    %38 = vector.load %arg5[%c0_19, %c0_20, %c0_21] : memref<1x64x32xf32, #tpu.memory_space<vmem>>, vector<1x64x32xf32>
    %39 = vector.shape_cast %38 : vector<1x64x32xf32> to vector<64x32xf32>
    %cst_22 = arith.constant dense<0.000000e+00> : vector<8x32xf32>
    %40 = tpu.matmul %37, %39, %cst_22 {dimension_numbers = #tpu.dot_dimension_numbers<[1], [0], [0], [1], [0, 0, 1, 1], [], []>} : vector<8x64xf32>, vector<64x32xf32>, vector<8x32xf32> -> vector<8x32xf32>
    %c0_23 = arith.constant 0 : index
    %c0_24 = arith.constant 0 : index
    %41 = vector.load %arg6[%c0_23, %c0_24] : memref<1x32xf32, #tpu.memory_space<vmem>>, vector<1x32xf32>
    %42 = vector.broadcast %41 : vector<1x32xf32> to vector<8x32xf32>
    %43 = arith.addf %40, %42 : vector<8x32xf32>
    %c0_25 = arith.constant 0 : index
    %c0_26 = arith.constant 0 : index
    %c0_27 = arith.constant 0 : index
    %44 = vector.load %arg7[%c0_25, %c0_26, %c0_27] : memref<1x32x16xf32, #tpu.memory_space<vmem>>, vector<1x32x16xf32>
    %45 = vector.shape_cast %44 : vector<1x32x16xf32> to vector<32x16xf32>
    %cst_28 = arith.constant dense<0.000000e+00> : vector<8x16xf32>
    %46 = tpu.matmul %43, %45, %cst_28 {dimension_numbers = #tpu.dot_dimension_numbers<[1], [0], [0], [1], [0, 0, 1, 1], [], []>} : vector<8x32xf32>, vector<32x16xf32>, vector<8x16xf32> -> vector<8x16xf32>
    %47 = math.tanh %46 : vector<8x16xf32>
    %cst_29 = arith.constant 1.000000e+01 : f32
    %48 = vector.broadcast %cst_29 : f32 to vector<8x16xf32>
    %49 = arith.mulf %48, %47 : vector<8x16xf32>
    %c0_30 = arith.constant 0 : index
    %c0_31 = arith.constant 0 : index
    %c0_32 = arith.constant 0 : index
    %50 = vector.load %arg8[%c0_30, %c0_31, %c0_32] : memref<1x8x16xf32, #tpu.memory_space<vmem>>, vector<1x8x16xf32>
    %51 = vector.shape_cast %50 : vector<1x8x16xf32> to vector<8x16xf32>
    %52 = arith.addf %49, %51 : vector<8x16xf32>
    %cst_33 = arith.constant dense<0xFF800000> : vector<8xf32>
    %53 = vector.multi_reduction <maximumf>, %52, %cst_33 [1] : vector<8x16xf32> to vector<8xf32>
    %54 = vector.shape_cast %53 : vector<8xf32> to vector<8x1xf32>
    %55 = vector.broadcast %54 : vector<8x1xf32> to vector<8x16xf32>
    %56 = arith.subf %52, %55 : vector<8x16xf32>
    %57 = math.exp %56 : vector<8x16xf32>
    %cst_34 = arith.constant dense<0.000000e+00> : vector<8xf32>
    %58 = vector.multi_reduction <add>, %57, %cst_34 [1] : vector<8x16xf32> to vector<8xf32>
    %59 = vector.shape_cast %58 : vector<8xf32> to vector<8x1xf32>
    %60 = tpu.reciprocal %59 {approx = true} : vector<8x1xf32> -> vector<8x1xf32>
    %61 = arith.mulf %59, %60 : vector<8x1xf32>
    %cst_35 = arith.constant 2.000000e+00 : f32
    %62 = vector.broadcast %cst_35 : f32 to vector<8x1xf32>
    %63 = arith.subf %62, %61 : vector<8x1xf32>
    %64 = arith.mulf %60, %63 : vector<8x1xf32>
    %65 = arith.mulf %59, %64 : vector<8x1xf32>
    %cst_36 = arith.constant 2.000000e+00 : f32
    %66 = vector.broadcast %cst_36 : f32 to vector<8x1xf32>
    %67 = arith.subf %66, %65 : vector<8x1xf32>
    %68 = arith.mulf %64, %67 : vector<8x1xf32>
    %69 = vector.broadcast %68 : vector<8x1xf32> to vector<8x16xf32>
    %70 = arith.mulf %57, %69 : vector<8x16xf32>
    %c0_37 = arith.constant 0 : index
    %c0_38 = arith.constant 0 : index
    %c0_39 = arith.constant 0 : index
    %71 = vector.load %arg9[%c0_37, %c0_38, %c0_39] : memref<1x8x16xf32, #tpu.memory_space<vmem>>, vector<1x8x16xf32>
    %72 = vector.shape_cast %71 : vector<1x8x16xf32> to vector<8x16xf32>
    %73 = vector.shape_cast %70 : vector<8x16xf32> to vector<1x8x16xf32>
    tpu.vector_store %arg9[%c0_37, %c0_38, %c0_39], %73 {strides = array<i32>} : memref<1x8x16xf32, #tpu.memory_space<vmem>>, vector<1x8x16xf32>,
    return
  }
  func.func @transform_0(%arg0: i32) -> (i32, i32, i32) {
    %c0_i32 = arith.constant 0 : i32
    %c0_i32_0 = arith.constant 0 : i32
    %c0_i32_1 = arith.constant 0 : i32
    return %arg0, %c0_i32, %c0_i32_0 : i32, i32, i32
  }
  func.func @transform_1(%arg0: i32) -> (i32, i32) {
    %c0_i32 = arith.constant 0 : i32
    %c0_i32_0 = arith.constant 0 : i32
    %c0_i32_1 = arith.constant 0 : i32
    return %c0_i32, %c0_i32_0 : i32, i32
  }
  func.func @transform_2(%arg0: i32) -> (i32, i32, i32) {
    %c0_i32 = arith.constant 0 : i32
    %c0_i32_0 = arith.constant 0 : i32
    %c0_i32_1 = arith.constant 0 : i32
    return %arg0, %c0_i32, %c0_i32_0 : i32, i32, i32
  }
  func.func @transform_3(%arg0: i32) -> (i32, i32, i32) {
    %c0_i32 = arith.constant 0 : i32
    %c0_i32_0 = arith.constant 0 : i32
    %c0_i32_1 = arith.constant 0 : i32
    return %arg0, %c0_i32, %c0_i32_0 : i32, i32, i32
  }
  func.func @transform_4(%arg0: i32) -> (i32, i32, i32) {
    %c0_i32 = arith.constant 0 : i32
    %c0_i32_0 = arith.constant 0 : i32
    %c0_i32_1 = arith.constant 0 : i32
    return %arg0, %c0_i32, %c0_i32_0 : i32, i32, i32
  }
  func.func @transform_5(%arg0: i32) -> (i32, i32) {
    %c0_i32 = arith.constant 0 : i32
    %c0_i32_0 = arith.constant 0 : i32
    %c0_i32_1 = arith.constant 0 : i32
    return %c0_i32, %c0_i32_0 : i32, i32
  }
  func.func @transform_6(%arg0: i32) -> (i32, i32, i32) {
    %c0_i32 = arith.constant 0 : i32
    %c0_i32_0 = arith.constant 0 : i32
    %c0_i32_1 = arith.constant 0 : i32
    return %arg0, %c0_i32, %c0_i32_0 : i32, i32, i32
  }
  func.func @transform_7(%arg0: i32) -> (i32, i32, i32) {
    %c0_i32 = arith.constant 0 : i32
    %c0_i32_0 = arith.constant 0 : i32
    %c0_i32_1 = arith.constant 0 : i32
    return %arg0, %c0_i32, %c0_i32_0 : i32, i32, i32
  }
  func.func @transform_8(%arg0: i32) -> (i32, i32, i32) {
    %c0_i32 = arith.constant 0 : i32
    %c0_i32_0 = arith.constant 0 : i32
    %c0_i32_1 = arith.constant 0 : i32
    return %arg0, %c0_i32, %c0_i32_0 : i32, i32, i32
  }
}

</mosaic_0001>

<bundles_post_ra>
// kernel: cvrp_decoder_forward.1
= control target key start
LH: loop header
LB: loop body
LE: loop exit
PB: predicated region body
PF: predicated region fallthrough
CT: control target
= control target key end

     0   :  { %13 = vsyncpa [#allocation3], 0  ;;  %s1509_s0 = inlined_call_operand.vmem [shape: f32[2,8,64], index: 0, kind: input, shape index: {}]   ;;  %s1510_s1 = inlined_call_operand.vmem [shape: f32[64,32], index: 1, kind: input, shape index: {}]   ;;  %s1511_s2 = inlined_call_operand.vmem [shape: f32[2,32,64], index: 2, kind: input, shape index: {}]   ;;  %s1512_s3 = inlined_call_operand.vmem [shape: f32[2,8,64], index: 3, kind: input, shape index: {}]   ;;  %s1513_s4 = inlined_call_operand.vmem [shape: f32[2,64,32], index: 4, kind: input, shape index: {}]   ;;  %s1514_s5 = inlined_call_operand.vmem [shape: f32[1,32], index: 5, kind: input, shape index: {}]   ;;  %s1515_s6 = inlined_call_operand.vmem [shape: f32[2,32,16], index: 6, kind: input, shape index: {}]   ;;  %s1516_s7 = inlined_call_operand.vmem [shape: f32[2,8,16], index: 7, kind: input, shape index: {}]   ;;  %s1517_s8 = inlined_call_operand.hbm [shape: f32[2,8,16], index: 8, kind: output, shape index: {}]  }
   0x1   :  { %15 = vsyncpa [#allocation3 + $0x1], 0  ;;  %s1315_s27 = smov 0   ;;  %s1317_s28 = smov 0  }
   0x2   :  { %s1319_s29 = smov 0   ;;  %s1321_s30 = smov 0  }
   0x3 LB: > { %s1336_s9 = sadd.s32 4294967295, %s1264_s30   ;;  %s1001_s10 = sadd.s32 4294967294, %s1264_s30   ;;  %s1264_s30 = sphi %s1321_s30, %s1523_s30   ;;  %s1260_s29 = sphi %s1319_s29, %s1522_s29   ;;  %s1256_s28 = sphi %s1317_s28, %s1521_s28   ;;  %s1252_s27 = sphi %s1315_s27, %s1520_s27  }
   0x4   : > { %s1340_s11 = sadd.s32 1, %s1264_s30   ;;  %s226_s12 = sadd.s32 1, %s1260_s29 }
   0x5   : > { %s223_s13 = ssub.s32 %s1264_s30, %s1340_s11  ;;  %p236_p0 = scmp.ne.s32.totalorder %s1260_s29, %s1256_s28 }
   0x6   : > { %p224_p1 = scmp.eq.s32.totalorder %s223_s13, 0  ;;  %p237_p2 = scmp.eq.s32.totalorder %s1336_s9, 1 }
   0x7   : > { %p242_p3 = scmp.ne.s32.totalorder %s1256_s28, %s1252_s27  ;;  %p243_p4 = scmp.eq.s32.totalorder %s1001_s10, 1 }
   0x8   : > { %s1351_s14 = scalar_select %p224_p1, %s1260_s29, %s226_s12  }
   0x9   : > { %p1353_p5 = por %p237_p2, %p236_p0  ;;  %p1357_p6 = por %p243_p4, %p242_p3 }
   0xa   : > { %p1004_p7 = scmp.ge.s32.totalorder %s1264_s30, 1  ;;  %p312_p8 = scmp.lt.s32.totalorder %s1264_s30, 3 }
   0xc   : > { %p313_p9 = pnand %p1004_p7, %p312_p8 }
   0xd   : > { %p368_p10 = scmp.lt.s32.totalorder (!%p313_p9), %s1336_s9, 1  ;;  %s1030_s24 = sshll.u32 (!%p313_p9), %s1336_s9, 7 }
   0xe   : > { %316 = sbr.rel (%p313_p9) target bundleno = 1547 (0x60b), region = 52  ;;  %s1269_s20 = smov (!%p313_p9), [#allocation2]  }
   0xf   : > { %s1208_s21 = sshll.u32 (!%p313_p9), %s1269_s20, 4  ;;  %s1209_s21 = int_to_ptr.vmem [resolvable:$false] %s1208_s21 }
  0x13   : > { %v403_v0 = vld [vmem:[%s1510_s1 + $0x38] sm:$0xff]  ;;  %v1266_v1 = vmov 0.0   ;;  %v402_v2 = vld [vmem:[%s1510_s1 + $0x30] sm:$0xff]  ;;  %vm1267_vm0 = vmmov 0   ;;  %v401_v3 = vld [vmem:[%s1510_s1 + $0x28] sm:$0xff]  ;;  %s1381_s23 = scalar_select %p368_p10, %s1336_s9, 1  ;;  %v563_v21 = vlaneseq }
  0x14   : > { %1073 = vmatprep.subr.mxu0 %v1266_v1  ;;  %1089 = vmatprep.mubr.msk.f32.mxu0 %vm1267_vm0, %v1266_v1  ;;  %v400_v4 = vld [vmem:[%s1510_s1 + $0x20] sm:$0xff]  ;;  %v399_v5 = vld [vmem:[%s1510_s1 + $0x18] sm:$0xff]  ;;  %v398_v8 = vld [vmem:[%s1510_s1 + $0x10] sm:$0xff]  ;;  %vm404_vm1 = vcmask 523264   ;;  %vm483_vm2 = vcmask 261120   ;;  %v1268_v30 = vmov 1.0  }
  0x15   : > { %1074 = vmatpush3.msra.mxu0 %v403_v0  ;;  %1092 = vmatprep.subr.mxu1 %v1266_v1  ;;  %s1033_s26 = sshll.u32 %s1381_s23, 5  ;;  %s1398_s19 = sshll.u32 %s1381_s23, 3  ;;  %v397_v10 = vld [vmem:[%s1510_s1 + $0x8] sm:$0xff]  ;;  %v396_v11 = vld [vmem:[%s1510_s1] sm:$0xff]  ;;  %v564_v22 = vshrl.u32 %v563_v21, 7  ;;  %v581_v24 = vand.u32 127, %v563_v21 }
  0x16   : > { %1075 = vmatprep.subr.mxu0 %v1266_v1  ;;  %1100 = vmatprep.mubr.msk.f32.mxu1 %vm1267_vm0, %v1266_v1  ;;  %s376_s18 = scalar_lea.vmem %s1511_s2, %s1033_s26  ;;  %s371_s12 = scalar_lea.vmem %s1509_s0, %s1398_s19  ;;  %vm849_vm11 = vcmask 130048  }
  0x17   : > { %1076 = vmatpush3.msra.mxu0 %v402_v2  ;;  %v481_v6 = vld [vmem:[%s376_s18 + $0x18] sm:$0xff]  ;;  %v480_v7 = vld [vmem:[%s376_s18 + $0x10] sm:$0xff]  ;;  %v479_v9 = vld [vmem:[%s376_s18 + $0x8] sm:$0xff]  ;;  %s380_s22 = scalar_lea.vmem %s1512_s3, %s1398_s19  ;;  %v571_v23 = vadd.s32 56, %v564_v22  ;;  %v582_v26 = vshra.s32 %v581_v24, 4  ;;  %v570_v27 = vadd.s32 48, %v564_v22  ;;  %s390_s17 = scalar_lea.vmem %s1515_s6, %s1033_s26 }
  0x18   : > { %1077 = vmatprep.subr.mxu0 %v1266_v1  ;;  %1093 = vmatpush3.msra.mxu1 %v481_v6  ;;  %v395_v12 = vld [vmem:[%s371_s12] sm:$0xff]  ;;  %v569_v29 = vadd.s32 40, %v564_v22  ;;  %v568_v32 = vadd.s32 32, %v564_v22  ;;  %v567_v33 = vadd.s32 24, %v564_v22  ;;  %v566_v34 = vadd.s32 16, %v564_v22  ;;  %v771_v53 = vld [vmem:[%s390_s17 + $0x18] sm:$0xff] }
  0x19   : > { %1078 = vmatpush3.msra.mxu0 %v401_v3  ;;  %1094 = vmatprep.subr.mxu1 %v1266_v1  ;;  %v478_v13 = vld [vmem:[%s376_s18] sm:$0xff]  ;;  %v579_v25 = vshra.s32 %v571_v23, 4  ;;  %v578_v28 = vshra.s32 %v570_v27, 4  ;;  %v565_v35 = vadd.s32 8, %v564_v22  ;;  %v572_v40 = vshra.s32 %v564_v22, 4  ;;  %s1034_s18 = sshll.u32 %s1381_s23, 6 }
  0x1a   : > { %1079 = vmatprep.subr.mxu0 %v1266_v1  ;;  %1095 = vmatpush3.msra.mxu1 %v480_v7  ;;  %v482_v16 = vld [vmem:[%s380_s22] sm:$0xff]  ;;  %v577_v31 = vshra.s32 %v569_v29, 4  ;;  %v576_v36 = vshra.s32 %v568_v32, 4  ;;  %v575_v37 = vshra.s32 %v567_v33, 4  ;;  %v574_v38 = vshra.s32 %v566_v34, 4  ;;  %s385_s10 = scalar_lea.vmem %s1513_s4, %s1034_s18  ;;  %v770_v54 = vld [vmem:[%s390_s17 + $0x10] sm:$0xff]  ;;  %s394_s22 = scalar_lea.vmem %s1516_s7, %s1398_s19 }
  0x1b   : > { %1080 = vmatpush3.msra.mxu0 %v400_v4  ;;  %1096 = vmatprep.subr.mxu1 %v1266_v1  ;;  %vm590_vm3 = vcmp.eq.s32.totalorder %v579_v25, %v582_v26  ;;  %vm589_vm4 = vcmp.eq.s32.totalorder %v578_v28, %v582_v26  ;;  %v573_v39 = vshra.s32 %v565_v35, 4  ;;  %vm583_vm10 = vcmp.eq.s32.totalorder %v572_v40, %v582_v26  ;;  %v687_v45 = vld [vmem:[%s385_s10 + $0x38] sm:$0xff]  ;;  %v686_v46 = vld [vmem:[%s385_s10 + $0x30] sm:$0xff]  ;;  %v685_v47 = vld [vmem:[%s385_s10 + $0x28] sm:$0xff]  ;;  %s365_s19 = sand.u32 1, %s1256_s28   ;;  %s1210_s9 = scalar_lea.vmem %s1209_s21, 256 }
  0x1c   : > { %1081 = vmatprep.subr.mxu0 %v1266_v1  ;;  %1097 = vmatpush3.msra.mxu1 %v479_v9  ;;  %vm588_vm5 = vcmp.eq.s32.totalorder %v577_v31, %v582_v26  ;;  %vm587_vm6 = vcmp.eq.s32.totalorder %v576_v36, %v582_v26  ;;  %vm586_vm7 = vcmp.eq.s32.totalorder %v575_v37, %v582_v26  ;;  %v684_v48 = vld [vmem:[%s385_s10 + $0x20] sm:$0xff]  ;;  %v683_v49 = vld [vmem:[%s385_s10 + $0x18] sm:$0xff]  ;;  %v682_v50 = vld [vmem:[%s385_s10 + $0x10] sm:$0xff]  ;;  %s1005_s18 = sshll.u32 %s365_s19, 3  ;;  %s869_s23 = scalar_lea.sflag [#allocation3], %s365_s19 }
  0x1d   : > { %1082 = vmatpush3.msra.mxu0 %v399_v5  ;;  %1098 = vmatprep.subr.mxu1 %v1266_v1  ;;  %vm585_vm8 = vcmp.eq.s32.totalorder %v574_v38, %v582_v26  ;;  %vm584_vm9 = vcmp.eq.s32.totalorder %v573_v39, %v582_v26  ;;  %v681_v51 = vld [vmem:[%s385_s10 + $0x8] sm:$0xff]  ;;  %v680_v52 = vld [vmem:[%s385_s10] sm:$0xff]  ;;  %s367_s25 = scalar_lea.vmem [#allocation2], %s1005_s18 }
  0x1e   : > { %1083 = vmatprep.subr.mxu0 %v1266_v1  ;;  %1099 = vmatpush3.msra.mxu1 %v478_v13  ;;  %v769_v3 = vld [vmem:[%s390_s17 + $0x8] sm:$0xff]  ;;  %v768_v4 = vld [vmem:[%s390_s17] sm:$0xff]  ;;  %s882_s10 = sshll.u32 %s367_s25, 4  ;;  %s880_s17 = scalar_lea.hbm %s1517_s8, %s1030_s24  ;;  %s883_s10 = int_to_ptr.vmem [resolvable:$true] %s882_s10 }
  0x1f   : > { %1084 = vmatpush3.msra.mxu0 %v398_v8  ;;  %1103 = vmatprep.subr.mxu1 %v1266_v1  ;;  %v1026_v5 = vld [vmem:[%s1514_s5] ss:$0 sm:$0xff]  ;;  %s1204_s26 = scalar_lea.vmem %s883_s10, 128  ;;  %p1211_p0 = scmp.lt.s32.totalorder %s883_s10, %s1209_s21 }
  0x20   : > { %1085 = vmatprep.subr.mxu0 %v1266_v1  ;;  %p1205_p11 = scmp.ne.s32.totalorder %s883_s10, %s1204_s26  ;;  %p1212_p1 = scmp.lt.s32.totalorder %s1210_s9, %s1204_s26 }
  0x21   : > { %1086 = vmatpush3.msra.mxu0 %v397_v10 }
  0x22   : > { %1087 = vmatprep.subr.mxu0 %v1266_v1  ;;  %p1206_p12 = pnand %p1205_p11, %p1353_p5  ;;  %p1213_p2 = por %p1212_p1, %p1211_p0 }
  0x23   : > { %1088 = vmatpush3.msra.mxu0 %v396_v11 }
  0x24   : > { %1090 = vmatmul.mubr.msk.f32.vlgmr.msra.gmra.mxu0 %vm404_vm1, %v395_v12  ;;  %1122 = vmatprep.subr.mxu0 %v1266_v1  ;;  %p1207_p13 = pneg %p1206_p12 }
  0x25   : > { %1138 = vmatprep.mubr.msk.f32.mxu0 %vm1267_vm0, %v1266_v1  ;;  %1123 = vmatpush3.msra.mxu0 %v687_v45 }
  0x26   : > { %1124 = vmatprep.subr.mxu0 %v1266_v1  ;;  %p1214_p3 = pnand %p1213_p2, %p1207_p13 }
  0x27   : > { %1125 = vmatpush3.msra.mxu0 %v686_v46 }
  0x28   : > { %1126 = vmatprep.subr.mxu0 %v1266_v1 }
  0x29   : > { %1127 = vmatpush3.msra.mxu0 %v685_v47 }
  0x2a   : > { %1128 = vmatprep.subr.mxu0 %v1266_v1 }
  0x2b   : > { %1129 = vmatpush3.msra.mxu0 %v684_v48 }
  0x2c   : > { %1130 = vmatprep.subr.mxu0 %v1266_v1 }
  0x2d   : > { %1131 = vmatpush3.msra.mxu0 %v683_v49 }
  0x2e   : > { %1132 = vmatprep.subr.mxu0 %v1266_v1 }
  0x2f   : > { %1133 = vmatpush3.msra.mxu0 %v682_v50 }
  0x30   : > { %1134 = vmatprep.subr.mxu0 %v1266_v1 }
  0x31   : > { %1135 = vmatpush3.msra.mxu0 %v681_v51 }
  0x32   : > { %1136 = vmatprep.subr.mxu0 %v1266_v1 }
  0x33   : > { %1137 = vmatpush3.msra.mxu0 %v680_v52 }
  0xe4   : > { %v474_v14 = vpop.f32.mrf.mxu0 }
  0xe5   : > { %1101 = vmatmul.mubr.msk.f32.vlgmr.msra.gmra.mxu1 %vm483_vm2, %v474_v14 }
  0xe6   : > { %v1091_v15 = vpop.f32.mrf.mxu0  ;;  %1119 = vmatprep.mubr.msk.f32.mxu1 %vm1267_vm0, %v1266_v1  ;;  %1104 = vmatpush3.msk.msra.mxu1 %vm590_vm3, %v1268_v30 }
  0xe7   : > { %1105 = vmatprep.subr.mxu1 %v1266_v1 }
  0xe8   : > { %1106 = vmatpush3.msk.msra.mxu1 %vm589_vm4, %v1268_v30 }
  0xe9   : > { %1107 = vmatprep.subr.mxu1 %v1266_v1 }
  0xea   : > { %1108 = vmatpush3.msk.msra.mxu1 %vm588_vm5, %v1268_v30 }
  0xeb   : > { %1109 = vmatprep.subr.mxu1 %v1266_v1 }
  0xec   : > { %1110 = vmatpush3.msk.msra.mxu1 %vm587_vm6, %v1268_v30 }
  0xed   : > { %1111 = vmatprep.subr.mxu1 %v1266_v1 }
  0xee   : > { %1112 = vmatpush3.msk.msra.mxu1 %vm586_vm7, %v1268_v30 }
  0xef   : > { %1113 = vmatprep.subr.mxu1 %v1266_v1 }
  0xf0   : > { %1114 = vmatpush3.msk.msra.mxu1 %vm585_vm8, %v1268_v30 }
  0xf1   : > { %1115 = vmatprep.subr.mxu1 %v1266_v1 }
  0xf2   : > { %1116 = vmatpush3.msk.msra.mxu1 %vm584_vm9, %v1268_v30 }
  0xf3   : > { %1117 = vmatprep.subr.mxu1 %v1266_v1 }
  0xf4   : > { %1118 = vmatpush3.msk.msra.mxu1 %vm583_vm10, %v1268_v30 }
  0xf5   : > { %1141 = vmatprep.subr.mxu1 %v1266_v1 }
 0x1a5   : > { %v553_v17 = vpop.f32.mrf.mxu1 }
 0x1a6   : > { %v554_v18 = vadd.f32 %v553_v17, %v482_v16 }
 0x1a7   : > { %v1102_v19 = vpop.f32.mrf.mxu1 }
 0x1a8   : > { %v557_v20 = vsel %vm404_vm1, %v554_v18, -inf }
 0x1a9   : > { %558 = vmax.xlane.f32.xlu0 %v557_v20 }
 0x232   : > { %v559_v41 = vpop.xlane.xlu0 %558 }
 0x233   : > { %v560_v42 = vsub.f32 %v554_v18, %v559_v41 }
 0x235   : > { %v561_v43 = vmul.f32 1.442695, %v560_v42 }
 0x237   : > { %1194 = vpow2.f32 %v561_v43 }
 0x244   : > { %v1195_v44 = vpop.eup %1194 }
 0x245   : > { %1120 = vmatmul.mubr.msk.f32.vlgmr.msra.gmra.mxu1 %vm404_vm1, %v1195_v44 }
 0x246   : > { %1149 = vmatprep.mubr.msk.f32.mxu1 %vm1267_vm0, %v1266_v1  ;;  %1142 = vmatpush3.msra.mxu1 %v771_v53 }
 0x247   : > { %1143 = vmatprep.subr.mxu1 %v1266_v1 }
 0x248   : > { %1144 = vmatpush3.msra.mxu1 %v770_v54 }
 0x249   : > { %1145 = vmatprep.subr.mxu1 %v1266_v1 }
 0x24a   : > { %1146 = vmatpush3.msra.mxu1 %v769_v3 }
 0x24b   : > { %1147 = vmatprep.subr.mxu1 %v1266_v1  ;;  %v847_v1 = vld [vmem:[%s394_s22] sm:$0xff] }
 0x24c   : > { %1148 = vmatpush3.msra.mxu1 %v768_v4 }
 0x305   : > { %v668_v55 = vpop.f32.mrf.mxu1 }
 0x306   : > { %v669_v56 = vadd.f32 1e-30, %v668_v55 }
 0x307   : > { %v1121_v57 = vpop.f32.mrf.mxu1 }
 0x308   : > { %1196 = vrcp.f32 %v669_v56 }
 0x315   : > { %v1197_v58 = vpop.eup %1196 }
 0x316   : > { %v673_v59 = vmul.f32 %v1197_v58, %v669_v56 }
 0x318   : > { %v674_v60 = vsub.f32 2.0, %v673_v59 }
 0x31a   : > { %v675_v61 = vmul.f32 %v1197_v58, %v674_v60 }
 0x31c   : > { %v676_v62 = vmul.f32 %v675_v61, %v669_v56 }
 0x31e   : > { %v677_v63 = vsub.f32 2.0, %v676_v62 }
 0x320   : > { %v678_v0 = vmul.f32 %v677_v63, %v675_v61 }
 0x322   : > { %v679_v2 = vmul.f32 %v1195_v44, %v678_v0 }
 0x324   : > { %1139 = vmatmul.mubr.msk.f32.vlgmr.msra.gmra.mxu0 %vm404_vm1, %v679_v2 }
 0x3e4   : > { %v764_v6 = vpop.f32.mrf.mxu0 }
 0x3e5   : > { %v765_v7 = vadd.f32 %v1026_v5, %v764_v6 }
 0x3e6   : > { %v1140_v8 = vpop.f32.mrf.mxu0 }
 0x3e7   : > { %1150 = vmatmul.mubr.msk.f32.vlgmr.msra.gmra.mxu1 %vm483_vm2, %v765_v7 }
 0x4a7   : > { %v841_v9 = vpop.f32.mrf.mxu1 }
 0x4a8   : > { %1198 = vtanh.f32 %v841_v9 }
 0x4a9   : > { %v1151_v10 = vpop.f32.mrf.mxu1 }
 0x4b5   : > { %v1199_v11 = vpop.eup %1198 }
 0x4b6   : > { %v846_v12 = vmul.f32 10.0, %v1199_v11 }
 0x4b8   : > { %v848_v13 = vadd.f32 %v847_v1, %v846_v12 }
 0x4ba   : > { %v850_v14 = vsel %vm849_vm11, %v848_v13, -inf }
 0x4bb   : > { %851 = vmax.xlane.f32.xlu0 %v850_v14 }
 0x544   : > { %v852_v15 = vpop.xlane.xlu0 %851 }
 0x545   : > { %v853_v16 = vsub.f32 %v848_v13, %v852_v15 }
 0x547   : > { %v854_v17 = vmul.f32 1.442695, %v853_v16 }
 0x549   : > { %1200 = vpow2.f32 %v854_v17 }
 0x556   : > { %v1201_v18 = vpop.eup %1200 }
 0x557   : > { %v856_v19 = vsel %vm849_vm11, %v1201_v18, 0.0 }
 0x558   : > { %857 = vadd.xlane.f32.xlu1 %v856_v19 }
 0x5e1   : > { %v858_v20 = vpop.xlane.xlu1 %857 }
 0x5e2   : > { %1202 = vrcp.f32 %v858_v20 }
 0x5ef   : > { %v1203_v21 = vpop.eup %1202 }
 0x5f0   : > { %v860_v22 = vmul.f32 %v1203_v21, %v858_v20 }
 0x5f2   : > { %v861_v23 = vsub.f32 2.0, %v860_v22 }
 0x5f4   : > { %v862_v24 = vmul.f32 %v1203_v21, %v861_v23 }
 0x5f6   : > { %v863_v25 = vmul.f32 %v862_v24, %v858_v20 }
 0x5f8   : > { %v864_v26 = vsub.f32 2.0, %v863_v25 }
 0x5fa   : > { %v865_v27 = vmul.f32 %v864_v26, %v862_v24 }
 0x5fc   : > { %v866_v28 = vmul.f32 %v1201_v18, %v865_v27 }
 0x5fe   : > { %867 = vst.msk [vmem:[%s367_s25] sm:$0xff] %vm849_vm11, %v866_v28 }
 0x5ff   : > { %1217 = shalt.err (!%p1214_p3)
}
 0x600   : > { %s1218_s22 = scalar_lea.hbm %s880_s17, 128  ;;  %s1222_s24 = scalar_lea.hbm %s1517_s8, 256 }
 0x601   : > { %p1219_p4 = scmp.ne.s32.totalorder %s880_s17, %s1218_s22  ;;  %p1223_p9 = scmp.lt.s32.totalorder %s880_s17, %s1517_s8 }
 0x602   : > { %p1224_p10 = scmp.lt.s32.totalorder %s1222_s24, %s1218_s22 }
 0x603   : > { %p1220_p7 = pnand %p1219_p4, %p1353_p5 }
 0x604   : > { %p1225_p11 = por %p1224_p10, %p1223_p9 }
 0x605   : > { %p1221_p8 = pneg %p1220_p7 }
 0x607   : > { %p1226_p12 = pnand %p1225_p11, %p1221_p8 }
 0x609   : > { %1229 = shalt.err (!%p1226_p12)
}
 0x60a   : > { %1152 = dma.vmem_to_hbm [thread:$0]  (%p1353_p5), %s883_s10, 128, %s880_s17, %s869_s23  }
 0x60b PF: > { %p1158_p13 = scmp.ge.s32.totalorder %s1264_s30, 2  ;;  %s894_s13 = sand.u32 1, %s1252_s27  }
 0x60c   : > { %s895_s26 = scalar_lea.sflag [#allocation3], %s894_s13 }
 0x60d   : > { %p1155_p0 = pnand %p1158_p13, %p1357_p6 }
 0x60f   : > { %p1156_p1 = pneg %p1155_p0 }
 0x611   : > { %1247 = dma.done.wait (%p1156_p1), %s895_s26, 128  }
 0x612   : > { %1249 = vsyncadd (%p1156_p1), %s895_s26, 4294967168  ;;  %p18_p2 = scmp.ge.s32.totalorder %s1340_s11, 4   ;;  %s1520_s27 = smov %s1256_s28 }
 0x613   : > { %s1521_s28 = smov %s1260_s29  ;;  %s1522_s29 = smov %s1351_s14 }
 0x614   : > { %s1523_s30 = smov %s1340_s11  ;;  %20 = sbr.rel (!%p18_p2) target bundleno = 3 (0x3), region = 102 }
 0x619   :  { %900 = vsyncpa [#allocation3], 1 }
 0x61a   :  { %902 = vsyncpa [#allocation3 + $0x1], 1 }

</bundles_post_ra>
